<compile_context>
chip_gen: v5e
topology: v5e:2x2
jax: 0.10.0
libtpu: 0.0.40
codegen_flags: <defaults>
</compile_context>

<pallas_src>
import jax
import jax.numpy as jnp
from jax import lax
from jax.experimental import pallas as pl
from jax.experimental.pallas import tpu as pltpu

BN_EPS = 1e-5
_MIB = 2 ** 20


def _round_up(x, m):
    return (x + m - 1) // m * m


def _vmem_capacity_bytes():
    try:
        return int(pltpu.get_tpu_info().vmem_capacity_bytes)
    except Exception:
        return 64 * _MIB  # conservative fallback: v7x per-TensorCore VMEM


# --------------------------------------------------------------------------- #
# Path 1: fully fused, VMEM-resident stack (small / medium batch).
# --------------------------------------------------------------------------- #
def _build_fused_kernel(num_layers, b_actual, b_pad, eps, mm_dtype):
    need_mask = b_pad > b_actual
    inv_b = 1.0 / float(b_actual)

    def kernel(*refs):
        # refs: x_ref, (w_ref, gb_ref) * num_layers, o_ref
        x_ref, o_ref = refs[0], refs[-1]
        layer_refs = refs[1:-1]

        if need_mask:
            row_ids = lax.broadcasted_iota(jnp.int32, (b_pad, 1), 0)
            row_mask = row_ids < b_actual  # [b_pad, 1]; padded rows must stay 0

        h = x_ref[...]  # [b_pad, C0_pad] in mm_dtype; padded rows/cols are exact zeros
        for layer in range(num_layers):
            w_ref, gb_ref = layer_refs[2 * layer: 2 * layer + 2]
            last = layer == num_layers - 1

            # MXU matmul (bf16 or f32 inputs), f32 accumulation.
            y = jnp.dot(h, w_ref[...], preferred_element_type=jnp.float32)

            # Training-mode BN statistics over the REAL batch.  Padded rows of y are
            # exactly zero (zero inputs, bias dropped), so the plain column sums already
            # equal the sums over valid rows -- no masking pass for the statistics.
            mean = jnp.sum(y, axis=0, keepdims=True) * inv_b
            var = jnp.maximum(
                jnp.sum(y * y, axis=0, keepdims=True) * inv_b - mean * mean, 0.0)

            # Fold mean-subtract + BN affine + ReLU into a single FMA pass; fuse the
            # cast back to the matmul dtype into the same epilogue.
            scale = gb_ref[0:1, :] * lax.rsqrt(var + eps)   # gamma row (0 on padding)
            shift = gb_ref[1:2, :] - mean * scale           # beta row
            out = jnp.maximum(y * scale + shift, 0.0)
            if need_mask and not last:
                # Keep padded rows exactly zero so the next layer's stats stay exact.
                out = jnp.where(row_mask, out, 0.0)
            h = out.astype(o_ref.dtype if last else mm_dtype)

        o_ref[...] = h

    return kernel


# --------------------------------------------------------------------------- #
# Path 2: per-layer batch-gridded kernels (large batch).
# --------------------------------------------------------------------------- #
def _build_grid_layer_kernel(apply_prev, mask_rows, b_actual, tile_b, mm_dtype):
    """One layer of the large-batch path.

    Applies the PREVIOUS layer's folded BN+ReLU epilogue (scale/shift) to the incoming
    pre-activation tile (skipped for layer 0, whose input is the raw x), matmuls with W,
    writes the new pre-activation tile and accumulates per-column sum / sum-of-squares
    into a grid-resident [2, C] output.
    """

    def kernel(*refs):
        if apply_prev:
            in_ref, ss_ref, w_ref, y_ref, stats_ref = refs
        else:
            in_ref, w_ref, y_ref, stats_ref = refs
        i = pl.program_id(0)

        @pl.when(i == 0)
        def _():
            stats_ref[...] = jnp.zeros_like(stats_ref)

        a = in_ref[...]
        if apply_prev:
            # Previous layer's BN + ReLU, folded to one FMA + max.
            a = jnp.maximum(a * ss_ref[0:1, :] + ss_ref[1:2, :], 0.0)
            if mask_rows:
                rows = lax.broadcasted_iota(jnp.int32, (tile_b, 1), 0) + i * tile_b
                a = jnp.where(rows < b_actual, a, 0.0)  # padded rows stay exact zeros
            a = a.astype(mm_dtype)

        y = jnp.dot(a, w_ref[...], preferred_element_type=jnp.float32)
        y_ref[...] = y
        stats_ref[...] += jnp.concatenate(
            [jnp.sum(y, axis=0, keepdims=True),
             jnp.sum(y * y, axis=0, keepdims=True)], axis=0)

    return kernel


def _grid_final_kernel(y_ref, ss_ref, o_ref):
    # Normalize + ReLU of the last layer's pre-activation tiles.
    o_ref[...] = jnp.maximum(
        y_ref[...] * ss_ref[0:1, :] + ss_ref[1:2, :], 0.0).astype(o_ref.dtype)


# --------------------------------------------------------------------------- #
# Module wrapper.
# --------------------------------------------------------------------------- #
class PointNetDecoderPallas:
    """Deterministically initialized JAX/Pallas equivalent of PointNetDecoder."""

    def __init__(self, in_channel, mlp, key, matmul_dtype=jnp.bfloat16,
                 force_grid=False, grid_tile_b=512):
        self.in_channel = int(in_channel)
        self.mlp = list(mlp)
        self.matmul_dtype = matmul_dtype
        self.force_grid = bool(force_grid)
        # Batch tile for the large-batch grid path (multiple of 16 keeps bf16 operands
        # sublane-aligned on the MXU feed path).
        self.grid_tile_b = _round_up(int(grid_tile_b), 16)

        self._mm_itemsize = jnp.dtype(matmul_dtype).itemsize
        self._b_align = 16 if self._mm_itemsize < 4 else 8

        # Unpadded params (PyTorch semantics: Linear has a bias, BN has gamma/beta).
        self.params = []
        last_channel = self.in_channel
        for out_channel in self.mlp:
            key, wk, bk = jax.random.split(key, 3)
            bound = 1.0 / (last_channel ** 0.5)
            # nn.Linear init: U(-1/sqrt(fan_in), 1/sqrt(fan_in)); stored as [in, out].
            w = jax.random.uniform(
                wk, (last_channel, out_channel), jnp.float32, -bound, bound)
            b = jax.random.uniform(bk, (out_channel,), jnp.float32, -bound, bound)
            gamma = jnp.ones((out_channel,), jnp.float32)   # BN weight
            beta = jnp.zeros((out_channel,), jnp.float32)   # BN bias
            self.params.append((w, b, gamma, beta))
            last_channel = out_channel

        # Lane-padded (multiple-of-128) kernel params.  The Linear bias is NOT passed
        # to the kernels (it cancels exactly under training-mode BatchNorm).  gamma and
        # beta are packed into a single [2, C_pad] operand per layer to cut the number
        # of tiny VMEM inputs / DMA descriptors in half.
        self.c0_pad = _round_up(self.in_channel, 128)
        self._padded = []      # [(w_pad [Cin_pad, Cout_pad], gb_pad [2, Cout_pad])]
        self._pad_dims = []    # [(Cin_pad, Cout_pad)]
        last_pad = self.c0_pad
        for (w, _b, gamma, beta), out_channel in zip(self.params, self.mlp):
            out_pad = _round_up(out_channel, 128)
            wp = jnp.zeros((last_pad, out_pad), matmul_dtype)
            wp = wp.at[: w.shape[0], :out_channel].set(w.astype(matmul_dtype))
            gb = jnp.zeros((2, out_pad), jnp.float32)
            gb = gb.at[0, :out_channel].set(gamma).at[1, :out_channel].set(beta)
            self._padded.append((wp, gb))
            self._pad_dims.append((last_pad, out_pad))
            last_pad = out_pad
        self.c_last = self.mlp[-1]
        self.c_last_pad = last_pad
        self.c_max_pad = max([self.c0_pad] + [d[1] for d in self._pad_dims])

        # Per-TensorCore VMEM budget; leave ~30% headroom for compiler scratch
        # (critical on v7x's 64 MiB VMEM).
        self._vmem_budget = int(0.7 * _vmem_capacity_bytes())

        self._fused_cache = {}
        self._grid_layer_cache = {}
        self._grid_final_cache = {}

    # ----------------------------- fused path ------------------------------ #
    def _fused_vmem_estimate(self, b_pad):
        est = b_pad * self.c0_pad * self._mm_itemsize                 # input
        for wp, gb in self._padded:
            est += wp.nbytes + gb.nbytes                              # weights + BN
        est += b_pad * self.c_last_pad * 4                            # output
        # Live activation tiles at the widest layer: y + out + one temp in f32 plus the
        # bf16/f32 h (the cast is fused into the epilogue, so only one mm-dtype copy).
        est += b_pad * self.c_max_pad * (3 * 4 + self._mm_itemsize)
        return int(est)

    def _make_fused_call(self, b, b_pad):
        kernel = _build_fused_kernel(len(self.mlp), b, b_pad, BN_EPS, self.matmul_dtype)
        vmem = pl.BlockSpec(memory_space=pltpu.MemorySpace.VMEM)
        n_in = 1 + 2 * len(self.mlp)

        est = self._fused_vmem_estimate(b_pad)
        vmem_limit = int(min(max(int(est * 1.25), 32 * _MIB), self._vmem_budget))

        flops = sum(2 * b_pad * ci * co for (ci, co) in self._pad_dims)
        transcend = sum(co for (_ci, co) in self._pad_dims)           # rsqrt per feature
        bytes_acc = (b_pad * self.c0_pad * self._mm_itemsize
                     + sum(wp.nbytes + gb.nbytes for wp, gb in self._padded)
                     + b_pad * self.c_last_pad * 4)

        return pl.pallas_call(
            kernel,
            out_shape=jax.ShapeDtypeStruct((b_pad, self.c_last_pad), jnp.float32),
            in_specs=[vmem] * n_in,
            out_specs=vmem,
            compiler_params=pltpu.CompilerParams(vmem_limit_bytes=vmem_limit),
            cost_estimate=pl.CostEstimate(flops=int(flops),
                                          transcendentals=int(transcend),
                                          bytes_accessed=int(bytes_acc)),
        )

    def _forward_fused(self, x):
        b = x.shape[0]
        b_pad = _round_up(b, self._b_align)
        x_p = jnp.zeros((b_pad, self.c0_pad), self.matmul_dtype)
        x_p = x_p.at[:b, : self.in_channel].set(x.astype(self.matmul_dtype))

        key = (b, b_pad)
        if key not in self._fused_cache:
            self._fused_cache[key] = self._make_fused_call(b, b_pad)
        flat = [x_p]
        for wp, gb in self._padded:
            flat += [wp, gb]
        out = self._fused_cache[key](*flat)
        return out[:b, : self.c_last]

    # ------------------------------ grid path ------------------------------ #
    def _make_grid_layer_call(self, layer, b, b_pad):
        tb = self.grid_tile_b
        cin_pad, cout_pad = self._pad_dims[layer]
        apply_prev = layer > 0
        mask_rows = apply_prev and (b_pad > b)
        in_itemsize = 4 if apply_prev else self._mm_itemsize
        wp, _gb = self._padded[layer]

        kernel = _build_grid_layer_kernel(apply_prev, mask_rows, b, tb, self.matmul_dtype)

        in_specs = [pl.BlockSpec((tb, cin_pad), lambda i: (i, 0))]
        if apply_prev:
            in_specs.append(pl.BlockSpec((2, cin_pad), lambda i: (0, 0)))
        in_specs.append(pl.BlockSpec((cin_pad, cout_pad), lambda i: (0, 0)))

        out_shape = (jax.ShapeDtypeStruct((b_pad, cout_pad), jnp.float32),
                     jax.ShapeDtypeStruct((2, cout_pad), jnp.float32))
        out_specs = (pl.BlockSpec((tb, cout_pad), lambda i: (i, 0)),
                     pl.BlockSpec((2, cout_pad), lambda i: (0, 0)))   # resident accum

        est = (2 * tb * cin_pad * in_itemsize            # double-buffered input tiles
               + 2 * tb * cout_pad * 4                   # double-buffered y tiles
               + 2 * wp.nbytes                           # resident weight (+ headroom)
               + 4 * 2 * (cin_pad + cout_pad) * 4        # ss / stats
               + tb * (cin_pad + cout_pad) * 4)          # live f32 temporaries
        vmem_limit = int(min(max(int(est * 1.25), 32 * _MIB), self._vmem_budget))

        flops = 2 * b_pad * cin_pad * cout_pad
        bytes_acc = (b_pad * cin_pad * in_itemsize + wp.nbytes
                     + b_pad * cout_pad * 4 + 2 * cout_pad * 4)

        return pl.pallas_call(
            kernel,
            grid=(b_pad // tb,),
            in_specs=in_specs,
            out_specs=out_specs,
            out_shape=out_shape,
            compiler_params=pltpu.CompilerParams(
                dimension_semantics=("arbitrary",),      # stats output is a reduction
                vmem_limit_bytes=vmem_limit),
            cost_estimate=pl.CostEstimate(flops=int(flops), transcendentals=0,
                                          bytes_accessed=int(bytes_acc)),
        )

    def _make_grid_final_call(self, b_pad):
        tb = self.grid_tile_b
        c = self.c_last_pad
        vmem_limit = int(min(max(4 * tb * c * 4 + 4 * _MIB, 32 * _MIB),
                             self._vmem_budget))
        return pl.pallas_call(
            _grid_final_kernel,
            grid=(b_pad // tb,),
            in_specs=[pl.BlockSpec((tb, c), lambda i: (i, 0)),
                      pl.BlockSpec((2, c), lambda i: (0, 0))],
            out_specs=pl.BlockSpec((tb, c), lambda i: (i, 0)),
            out_shape=jax.ShapeDtypeStruct((b_pad, c), jnp.float32),
            compiler_params=pltpu.CompilerParams(
                dimension_semantics=("parallel",),       # megacore-shardable
                vmem_limit_bytes=vmem_limit),
            cost_estimate=pl.CostEstimate(flops=int(2 * b_pad * c), transcendentals=0,
                                          bytes_accessed=int(2 * b_pad * c * 4 + 2 * c * 4)),
        )

    @staticmethod
    def _fold_stats(stats, gb, b):
        # stats: [2, C_pad] = (column sum, column sum of squares) over the REAL batch.
        inv_b = 1.0 / float(b)
        mean = stats[0] * inv_b
        var = jnp.maximum(stats[1] * inv_b - mean * mean, 0.0)
        scale = gb[0] * lax.rsqrt(var + BN_EPS)          # padded cols: gamma==0 -> 0
        shift = gb[1] - mean * scale
        return jnp.stack([scale, shift], axis=0)         # [2, C_pad]

    def _forward_grid(self, x):
        b = x.shape[0]
        tb = self.grid_tile_b
        b_pad = _round_up(b, tb)
        x_p = jnp.zeros((b_pad, self.c0_pad), self.matmul_dtype)
        x_p = x_p.at[:b, : self.in_channel].set(x.astype(self.matmul_dtype))

        y, ss = x_p, None
        for layer, (wp, gb) in enumerate(self._padded):
            key = (layer, b, b_pad)
            if key not in self._grid_layer_cache:
                self._grid_layer_cache[key] = self._make_grid_layer_call(layer, b, b_pad)
            call = self._grid_layer_cache[key]
            y, stats = call(y, wp) if layer == 0 else call(y, ss, wp)
            ss = self._fold_stats(stats, gb, b)

        if b_pad not in self._grid_final_cache:
            self._grid_final_cache[b_pad] = self._make_grid_final_call(b_pad)
        out = self._grid_final_cache[b_pad](y, ss)
        return out[:b, : self.c_last]

    # ------------------------------------------------------------------------ #
    def __call__(self, x):
        b, c_in = x.shape
        assert c_in == self.in_channel
        b_pad = _round_up(b, self._b_align)
        if self.force_grid or self._fused_vmem_estimate(b_pad) > self._vmem_budget:
            return self._forward_grid(x)
        return self._forward_fused(x)


def _reference(x, params):
    # Plain-JAX reference of the PyTorch forward (bias INCLUDED, training-mode BN with
    # biased batch variance) -- proves the in-kernel bias cancellation is exact.
    for (w, b, gamma, beta) in params:
        y = x @ w + b
        mean = jnp.mean(y, axis=0, keepdims=True)
        var = jnp.mean((y - mean) ** 2, axis=0, keepdims=True)
        y = gamma * (y - mean) / jnp.sqrt(var + BN_EPS) + beta
        x = jnp.maximum(y, 0.0)
    return x


if __name__ == "__main__":
    key = jax.random.PRNGKey(0)
    key, xkey, pkey = jax.random.split(key, 3)

    batch = 8
    in_channel = 32
    mlp = [64, 32]

    x = jax.random.normal(xkey, (batch, in_channel), jnp.float32)

    # f32 matmul, fused path: strict check against the PyTorch-semantics reference.
    model_f32 = PointNetDecoderPallas(in_channel, mlp, pkey, matmul_dtype=jnp.float32)
    out_f32 = jax.block_until_ready(model_f32(x))
    ref = _reference(x, model_f32.params)
    assert out_f32.shape == (batch, mlp[-1])
    assert jnp.allclose(out_f32, ref, atol=1e-4, rtol=1e-4)

    # Default bf16 matmul (f32 accumulation, f32 BN), fused path — the MXU fast path.
    model_bf16 = PointNetDecoderPallas(in_channel, mlp, pkey)
    out_bf16 = jax.block_until_ready(model_bf16(x))
    assert out_bf16.shape == (batch, mlp[-1])
    assert jnp.allclose(out_bf16, ref, atol=1e-1, rtol=1e-1)

    # Large-batch grid path (forced, with tiny batch tiles so multi-tile stats
    # accumulation and padded-row masking are exercised); f32 for a strict-ish check.
    batch_big = 40
    xg = jax.random.normal(key, (batch_big, in_channel), jnp.float32)
    model_grid = PointNetDecoderPallas(in_channel, mlp, pkey, matmul_dtype=jnp.float32,
                                       force_grid=True, grid_tile_b=16)
    out_grid = jax.block_until_ready(model_grid(xg))
    ref_grid = _reference(xg, model_grid.params)
    assert out_grid.shape == (batch_big, mlp[-1])
    assert jnp.allclose(out_grid, ref_grid, atol=2e-3, rtol=2e-3)

    print("KERNEL_OK")
</pallas_src>

<mosaic_0001>
module attributes {stable_mosaic.version = 11 : i64} {
  func.func @kernel(%arg0: memref<8x128xf32, #tpu.memory_space<vmem>>, %arg1: memref<128x128xf32, #tpu.memory_space<vmem>>, %arg2: memref<2x128xf32, #tpu.memory_space<vmem>>, %arg3: memref<128x128xf32, #tpu.memory_space<vmem>>, %arg4: memref<2x128xf32, #tpu.memory_space<vmem>>, %arg5: memref<8x128xf32, #tpu.memory_space<vmem>>) attributes {dimension_semantics = [], scalar_prefetch = 0 : i64, scratch_operands = 0 : i64, tpu.core_type = #tpu.core_type<tc>} {
    %c0 = arith.constant 0 : index
    %c0_0 = arith.constant 0 : index
    %0 = vector.load %arg0[%c0, %c0_0] : memref<8x128xf32, #tpu.memory_space<vmem>>, vector<8x128xf32>
    %c0_1 = arith.constant 0 : index
    %c0_2 = arith.constant 0 : index
    %1 = vector.load %arg1[%c0_1, %c0_2] : memref<128x128xf32, #tpu.memory_space<vmem>>, vector<128x128xf32>
    %cst = arith.constant dense<0.000000e+00> : vector<8x128xf32>
    %2 = tpu.matmul %0, %1, %cst {dimension_numbers = #tpu.dot_dimension_numbers<[1], [0], [0], [1], [0, 0, 1, 1], [], []>} : vector<8x128xf32>, vector<128x128xf32>, vector<8x128xf32> -> vector<8x128xf32>
    %cst_3 = arith.constant dense<0.000000e+00> : vector<128xf32>
    %3 = vector.multi_reduction <add>, %2, %cst_3 [0] : vector<8x128xf32> to vector<128xf32>
    %4 = vector.shape_cast %3 : vector<128xf32> to vector<1x128xf32>
    %cst_4 = arith.constant 1.250000e-01 : f32
    %5 = vector.broadcast %cst_4 : f32 to vector<1x128xf32>
    %6 = arith.mulf %4, %5 : vector<1x128xf32>
    %7 = arith.mulf %2, %2 : vector<8x128xf32>
    %cst_5 = arith.constant dense<0.000000e+00> : vector<128xf32>
    %8 = vector.multi_reduction <add>, %7, %cst_5 [0] : vector<8x128xf32> to vector<128xf32>
    %9 = vector.shape_cast %8 : vector<128xf32> to vector<1x128xf32>
    %cst_6 = arith.constant 1.250000e-01 : f32
    %10 = vector.broadcast %cst_6 : f32 to vector<1x128xf32>
    %11 = arith.mulf %9, %10 : vector<1x128xf32>
    %12 = arith.mulf %6, %6 : vector<1x128xf32>
    %13 = arith.subf %11, %12 : vector<1x128xf32>
    %cst_7 = arith.constant 0.000000e+00 : f32
    %14 = vector.broadcast %cst_7 : f32 to vector<1x128xf32>
    %15 = arith.maximumf %13, %14 : vector<1x128xf32>
    %c0_8 = arith.constant 0 : index
    %c0_9 = arith.constant 0 : index
    %16 = vector.load %arg2[%c0_8, %c0_9] : memref<2x128xf32, #tpu.memory_space<vmem>>, vector<1x128xf32>
    %cst_10 = arith.constant 9.99999974E-6 : f32
    %17 = vector.broadcast %cst_10 : f32 to vector<1x128xf32>
    %18 = arith.addf %15, %17 : vector<1x128xf32>
    %19 = math.rsqrt %18 : vector<1x128xf32>
    %20 = arith.mulf %16, %19 : vector<1x128xf32>
    %c1 = arith.constant 1 : index
    %c0_11 = arith.constant 0 : index
    %21 = vector.load %arg2[%c1, %c0_11] : memref<2x128xf32, #tpu.memory_space<vmem>>, vector<1x128xf32>
    %22 = arith.mulf %6, %20 : vector<1x128xf32>
    %23 = arith.subf %21, %22 : vector<1x128xf32>
    %24 = vector.broadcast %20 : vector<1x128xf32> to vector<8x128xf32>
    %25 = arith.mulf %2, %24 : vector<8x128xf32>
    %26 = vector.broadcast %23 : vector<1x128xf32> to vector<8x128xf32>
    %27 = arith.addf %25, %26 : vector<8x128xf32>
    %cst_12 = arith.constant 0.000000e+00 : f32
    %28 = vector.broadcast %cst_12 : f32 to vector<8x128xf32>
    %29 = arith.maximumf %27, %28 : vector<8x128xf32>
    %c0_13 = arith.constant 0 : index
    %c0_14 = arith.constant 0 : index
    %30 = vector.load %arg3[%c0_13, %c0_14] : memref<128x128xf32, #tpu.memory_space<vmem>>, vector<128x128xf32>
    %cst_15 = arith.constant dense<0.000000e+00> : vector<8x128xf32>
    %31 = tpu.matmul %29, %30, %cst_15 {dimension_numbers = #tpu.dot_dimension_numbers<[1], [0], [0], [1], [0, 0, 1, 1], [], []>} : vector<8x128xf32>, vector<128x128xf32>, vector<8x128xf32> -> vector<8x128xf32>
    %cst_16 = arith.constant dense<0.000000e+00> : vector<128xf32>
    %32 = vector.multi_reduction <add>, %31, %cst_16 [0] : vector<8x128xf32> to vector<128xf32>
    %33 = vector.shape_cast %32 : vector<128xf32> to vector<1x128xf32>
    %cst_17 = arith.constant 1.250000e-01 : f32
    %34 = vector.broadcast %cst_17 : f32 to vector<1x128xf32>
    %35 = arith.mulf %33, %34 : vector<1x128xf32>
    %36 = arith.mulf %31, %31 : vector<8x128xf32>
    %cst_18 = arith.constant dense<0.000000e+00> : vector<128xf32>
    %37 = vector.multi_reduction <add>, %36, %cst_18 [0] : vector<8x128xf32> to vector<128xf32>
    %38 = vector.shape_cast %37 : vector<128xf32> to vector<1x128xf32>
    %cst_19 = arith.constant 1.250000e-01 : f32
    %39 = vector.broadcast %cst_19 : f32 to vector<1x128xf32>
    %40 = arith.mulf %38, %39 : vector<1x128xf32>
    %41 = arith.mulf %35, %35 : vector<1x128xf32>
    %42 = arith.subf %40, %41 : vector<1x128xf32>
    %cst_20 = arith.constant 0.000000e+00 : f32
    %43 = vector.broadcast %cst_20 : f32 to vector<1x128xf32>
    %44 = arith.maximumf %42, %43 : vector<1x128xf32>
    %c0_21 = arith.constant 0 : index
    %c0_22 = arith.constant 0 : index
    %45 = vector.load %arg4[%c0_21, %c0_22] : memref<2x128xf32, #tpu.memory_space<vmem>>, vector<1x128xf32>
    %cst_23 = arith.constant 9.99999974E-6 : f32
    %46 = vector.broadcast %cst_23 : f32 to vector<1x128xf32>
    %47 = arith.addf %44, %46 : vector<1x128xf32>
    %48 = math.rsqrt %47 : vector<1x128xf32>
    %49 = arith.mulf %45, %48 : vector<1x128xf32>
    %c1_24 = arith.constant 1 : index
    %c0_25 = arith.constant 0 : index
    %50 = vector.load %arg4[%c1_24, %c0_25] : memref<2x128xf32, #tpu.memory_space<vmem>>, vector<1x128xf32>
    %51 = arith.mulf %35, %49 : vector<1x128xf32>
    %52 = arith.subf %50, %51 : vector<1x128xf32>
    %53 = vector.broadcast %49 : vector<1x128xf32> to vector<8x128xf32>
    %54 = arith.mulf %31, %53 : vector<8x128xf32>
    %55 = vector.broadcast %52 : vector<1x128xf32> to vector<8x128xf32>
    %56 = arith.addf %54, %55 : vector<8x128xf32>
    %cst_26 = arith.constant 0.000000e+00 : f32
    %57 = vector.broadcast %cst_26 : f32 to vector<8x128xf32>
    %58 = arith.maximumf %56, %57 : vector<8x128xf32>
    %c0_27 = arith.constant 0 : index
    %c0_28 = arith.constant 0 : index
    %59 = vector.load %arg5[%c0_27, %c0_28] : memref<8x128xf32, #tpu.memory_space<vmem>>, vector<8x128xf32>
    tpu.vector_store %arg5[%c0_27, %c0_28], %58 {strides = array<i32>} : memref<8x128xf32, #tpu.memory_space<vmem>>, vector<8x128xf32>,
    return
  }
}

</mosaic_0001>

<bundles_post_ra>
// kernel: tpu_custom_call.1
= control target key start
LH: loop header
LB: loop body
LE: loop exit
PB: predicated region body
PF: predicated region fallthrough
CT: control target
= control target key end

     0   :  { %10 = vsyncpa [#allocation3], 0  ;;  %s448_s0 = inlined_call_operand.hbm [shape: f32[8,128], index: 0, kind: input, shape index: {}]   ;;  %s449_s1 = inlined_call_operand.hbm [shape: f32[128,128], index: 1, kind: input, shape index: {}]   ;;  %s450_s2 = inlined_call_operand.hbm [shape: f32[2,128], index: 2, kind: input, shape index: {}]   ;;  %s451_s3 = inlined_call_operand.hbm [shape: f32[128,128], index: 3, kind: input, shape index: {}]   ;;  %s452_s4 = inlined_call_operand.vmem [shape: f32[2,128], index: 4, kind: input, shape index: {}]   ;;  %s453_s5 = inlined_call_operand.hbm [shape: f32[8,128], index: 5, kind: output, shape index: {}]  }
   0x1   :  { %11 = vsyncpa [#allocation6], 0 }
   0x2   :  { %12 = vsyncpa [#allocation9], 0  ;;  %s29_s20 = sshll.u32 %s449_s1, 4  ;;  %s30_s20 = int_to_ptr.hbm [resolvable:$true] %s29_s20 }
   0x3   :  { %13 = vsyncpa [#allocation4], 0  ;;  %s390_s21 = smov [#allocation5]   ;;  %s19_s25 = sshll.u32 %s448_s0, 4  ;;  %s20_s25 = int_to_ptr.hbm [resolvable:$true] %s19_s25 }
   0x4   :  { %s31_s22 = sshll.u32 %s390_s21, 4  ;;  %s391_s26 = smov 128   ;;  %s32_s22 = int_to_ptr.vmem [resolvable:$true] %s31_s22 }
   0x5   :  { %s392_s27 = smov 8   ;;  %s393_s28 = smov [#allocation2]  }
   0x6   :  { %37 = dma.hbm_to_vmem [thread:$0]  %s30_s20, 2048, %s32_s22, [#allocation6], %s391_s26, %s391_s26, %s392_s27  }
   0x7   :  { %s21_s29 = sshll.u32 %s393_s28, 4  ;;  %s43_s7 = sshll.u32 %s450_s2, 4  ;;  %s22_s29 = int_to_ptr.vmem [resolvable:$true] %s21_s29  ;;  %s44_s7 = int_to_ptr.hbm [resolvable:$true] %s43_s7 }
   0x8   :  { %24 = dma.hbm_to_vmem [thread:$0]  %s20_s25, 128, %s22_s29, [#allocation3]  }
   0x9   :  { %s53_s9 = sshll.u32 %s451_s3, 4  ;;  %s394_s10 = smov [#allocation7]   ;;  %s54_s9 = int_to_ptr.hbm [resolvable:$true] %s53_s9 }
   0xa   :  { %s45_s11 = sshll.u32 %s394_s10, 4  ;;  %s395_s0 = smov [#allocation8]   ;;  %s46_s11 = int_to_ptr.vmem [resolvable:$true] %s45_s11 }
   0xb   :  { %48 = dma.hbm_to_vmem [thread:$0]  %s44_s7, 32, %s46_s11, [#allocation6]  }
   0xc   :  { %s55_s12 = sshll.u32 %s395_s0, 4  ;;  %s56_s12 = int_to_ptr.vmem [resolvable:$true] %s55_s12 }
   0xd   :  { %61 = dma.hbm_to_vmem [thread:$0]  %s54_s9, 2048, %s56_s12, [#allocation9], %s391_s26, %s391_s26, %s392_s27  }
   0xe   :  { %382 = dma.done.wait [#allocation3], 128  }
   0xf   :  { %383 = vsyncadd [#allocation3], 4294967168 }
  0x10   :  { %384 = dma.done.wait [#allocation6], 2080  }
  0x11   :  { %385 = vsyncadd [#allocation6], 4294965216 }
  0x12   :  { %386 = dma.done.wait [#allocation9], 2048  }
  0x13   :  { %387 = vsyncadd [#allocation9], 4294965248  ;;  %v96_v0 = vld [vmem:[#allocation5 + $0x78] sm:$0xff]  ;;  %v95_v1 = vld [vmem:[#allocation5 + $0x70] sm:$0xff]  ;;  %s396_s15 = smov [#allocation10]   ;;  %s239_s19 = sshll.u32 %s453_s5, 4  ;;  %s240_s19 = int_to_ptr.hbm [resolvable:$true] %s239_s19 }
  0x14   :  { %97 = vmatpush.msra.mxu0 %v96_v0  ;;  %v94_v2 = vld [vmem:[#allocation5 + $0x68] sm:$0xff]  ;;  %v93_v3 = vld [vmem:[#allocation5 + $0x60] sm:$0xff]  ;;  %v92_v4 = vld [vmem:[#allocation5 + $0x58] sm:$0xff]  ;;  %s237_s16 = sshll.u32 %s396_s15, 4  ;;  %s238_s16 = int_to_ptr.vmem [resolvable:$true] %s237_s16 }
  0x15   :  { %v91_v5 = vld [vmem:[#allocation5 + $0x50] sm:$0xff]  ;;  %v90_v6 = vld [vmem:[#allocation5 + $0x48] sm:$0xff]  ;;  %v89_v7 = vld [vmem:[#allocation5 + $0x40] sm:$0xff] }
  0x16   :  { %98 = vmatpush.msra.mxu0 %v95_v1  ;;  %v88_v8 = vld [vmem:[#allocation5 + $0x38] sm:$0xff]  ;;  %v87_v9 = vld [vmem:[#allocation5 + $0x30] sm:$0xff]  ;;  %v86_v10 = vld [vmem:[#allocation5 + $0x28] sm:$0xff] }
  0x17   :  { %v85_v11 = vld [vmem:[#allocation5 + $0x20] sm:$0xff]  ;;  %v84_v12 = vld [vmem:[#allocation5 + $0x18] sm:$0xff]  ;;  %v83_v13 = vld [vmem:[#allocation5 + $0x10] sm:$0xff] }
  0x18   :  { %99 = vmatpush.msra.mxu0 %v94_v2  ;;  %v82_v14 = vld [vmem:[#allocation5 + $0x8] sm:$0xff]  ;;  %v81_v15 = vld [vmem:[#allocation5] sm:$0xff]  ;;  %v80_v16 = vld [vmem:[#allocation2] sm:$0xff] }
  0x19   :  { %v171_v17 = vld [vmem:[#allocation8 + $0x78] sm:$0xff]  ;;  %v170_v18 = vld [vmem:[#allocation8 + $0x70] sm:$0xff]  ;;  %v169_v19 = vld [vmem:[#allocation8 + $0x68] sm:$0xff] }
  0x1a   :  { %100 = vmatpush.msra.mxu0 %v93_v3  ;;  %172 = vmatpush.msra.mxu1 %v171_v17  ;;  %v168_v20 = vld [vmem:[#allocation8 + $0x60] sm:$0xff]  ;;  %v167_v21 = vld [vmem:[#allocation8 + $0x58] sm:$0xff]  ;;  %v166_v22 = vld [vmem:[#allocation8 + $0x50] sm:$0xff] }
  0x1b   :  { %v165_v26 = vld [vmem:[#allocation8 + $0x48] sm:$0xff]  ;;  %v164_v29 = vld [vmem:[#allocation8 + $0x40] sm:$0xff]  ;;  %v163_v32 = vld [vmem:[#allocation8 + $0x38] sm:$0xff] }
  0x1c   :  { %101 = vmatpush.msra.mxu0 %v92_v4  ;;  %173 = vmatpush.msra.mxu1 %v170_v18  ;;  %v162_v35 = vld [vmem:[#allocation8 + $0x30] sm:$0xff]  ;;  %v161_v38 = vld [vmem:[#allocation8 + $0x28] sm:$0xff]  ;;  %v160_v41 = vld [vmem:[#allocation8 + $0x20] sm:$0xff] }
  0x1d   :  { %v159_v44 = vld [vmem:[#allocation8 + $0x18] sm:$0xff]  ;;  %v158_v45 = vld [vmem:[#allocation8 + $0x10] sm:$0xff]  ;;  %v157_v48 = vld [vmem:[#allocation8 + $0x8] sm:$0xff] }
  0x1e   :  { %102 = vmatpush.msra.mxu0 %v91_v5  ;;  %174 = vmatpush.msra.mxu1 %v169_v19  ;;  %v156_v50 = vld [vmem:[#allocation8] sm:$0xff]  ;;  %v135_v58 = vld [vmem:[#allocation7] sm:$0x1]  ;;  %v148_v62 = vld [vmem:[#allocation7 + $0x1] sm:$0x1] }
  0x20   :  { %103 = vmatpush.msra.mxu0 %v90_v6  ;;  %175 = vmatpush.msra.mxu1 %v168_v20 }
  0x22   :  { %104 = vmatpush.msra.mxu0 %v89_v7  ;;  %176 = vmatpush.msra.mxu1 %v167_v21 }
  0x24   :  { %105 = vmatpush.msra.mxu0 %v88_v8  ;;  %177 = vmatpush.msra.mxu1 %v166_v22 }
  0x26   :  { %106 = vmatpush.msra.mxu0 %v87_v9  ;;  %178 = vmatpush.msra.mxu1 %v165_v26 }
  0x28   :  { %107 = vmatpush.msra.mxu0 %v86_v10  ;;  %179 = vmatpush.msra.mxu1 %v164_v29 }
  0x2a   :  { %108 = vmatpush.msra.mxu0 %v85_v11  ;;  %180 = vmatpush.msra.mxu1 %v163_v32 }
  0x2c   :  { %109 = vmatpush.msra.mxu0 %v84_v12  ;;  %181 = vmatpush.msra.mxu1 %v162_v35  ;;  %v223_v35 = vld [vmem:[%s452_s4 + $0x1] sm:$0x1] }
  0x2e   :  { %110 = vmatpush.msra.mxu0 %v83_v13  ;;  %182 = vmatpush.msra.mxu1 %v161_v38 }
  0x30   :  { %111 = vmatpush.msra.mxu0 %v82_v14  ;;  %183 = vmatpush.msra.mxu1 %v160_v41 }
  0x32   :  { %112 = vmatpush.msra.mxu0 %v81_v15  ;;  %184 = vmatpush.msra.mxu1 %v159_v44 }
  0x33   :  { %113 = vmatmul.f32.vlgmr.msra.gmra.mxu0 %v80_v16 }
  0x34   :  { %185 = vmatpush.msra.mxu1 %v158_v45 }
  0x36   :  { %186 = vmatpush.msra.mxu1 %v157_v48 }
  0x38   :  { %187 = vmatpush.msra.mxu1 %v156_v50 }
  0xb0   :  { %v114_v23 = vpop.f32.mrf.mxu0 }
  0xb1   :  { %v117_v24 = vrot.slane %v114_v23, 4  ;;  %v124_v25 = vmul.f32 %v114_v23, %v114_v23 }
  0xb3   :  { %v118_v27 = vadd.f32 %v117_v24, %v114_v23  ;;  %v125_v28 = vrot.slane %v124_v25, 4 }
  0xb5   :  { %v119_v30 = vrot.slane %v118_v27, 2  ;;  %v126_v31 = vadd.f32 %v125_v28, %v124_v25 }
  0xb7   :  { %v120_v33 = vadd.f32 %v119_v30, %v118_v27  ;;  %v127_v34 = vrot.slane %v126_v31, 2 }
  0xb9   :  { %v121_v36 = vrot.slane %v120_v33, 1  ;;  %v128_v37 = vadd.f32 %v127_v34, %v126_v31  ;;  %v210_v31 = vld [vmem:[%s452_s4] sm:$0x1] }
  0xbb   :  { %v122_v39 = vadd.f32 %v121_v36, %v120_v33  ;;  %v129_v40 = vrot.slane %v128_v37, 1 }
  0xbd   :  { %v123_v42 = vmul.f32 0.125, %v122_v39  ;;  %v130_v43 = vadd.f32 %v129_v40, %v128_v37 }
  0xbf   :  { %v131_v46 = vmul.f32 0.125, %v130_v43  ;;  %v132_v47 = vmul.f32 %v123_v42, %v123_v42 }
  0xc1   :  { %v133_v49 = vsub.f32 %v131_v46, %v132_v47 }
  0xc3   :  { %v134_v51 = vmax.f32 %v133_v49, 0.0 }
  0xc5   :  { %v136_v52 = vadd.f32 1e-05, %v134_v51 }
  0xc7   :  { %258 = vrsqrt.f32 %v136_v52  ;;  %vm143_vm1 = vweird.f32 %v136_v52 }
  0xcd   :  { %v259_v53 = vpop.eup %258 }
  0xce   :  { %v138_v54 = vmul.f32 %v259_v53, %v136_v52  ;;  %vm144_vm0 = vweird.f32 %v259_v53 }
  0xcf   :  { %vm145_vm2 = vmor %vm143_vm1, %vm144_vm0 }
  0xd0   :  { %v139_v55 = vmul.f32 %v259_v53, %v138_v54 }
  0xd2   :  { %v140_v56 = vmul.f32 0.5, %v139_v55 }
  0xd4   :  { %v141_v57 = vsub.f32 1.5, %v140_v56 }
  0xd6   :  { %v142_v59 = vmul.f32 %v259_v53, %v141_v57 }
  0xd8   :  { %v146_v60 = vsel %vm145_vm2, %v259_v53, %v142_v59 }
  0xd9   :  { %v147_v61 = vmul.f32 %v146_v60, %v135_v58 }
  0xdb   :  { %v151_v63 = vperm.slane %v147_v61, 0  ;;  %v149_v0 = vmul.f32 %v147_v61, %v123_v42 }
  0xdd   :  { %v150_v1 = vsub.f32 %v148_v62, %v149_v0  ;;  %v152_v2 = vmul.f32 %v151_v63, %v114_v23 }
  0xdf   :  { %v153_v3 = vperm.slane %v150_v1, 0 }
  0xe1   :  { %v154_v4 = vadd.f32 %v153_v3, %v152_v2 }
  0xe3   :  { %v155_v5 = vmax.f32 %v154_v4, 0.0 }
  0xe5   :  { %188 = vmatmul.f32.vlgmr.msra.gmra.mxu1 %v155_v5 }
 0x162   :  { %v189_v6 = vpop.f32.mrf.mxu1 }
 0x163   :  { %v192_v7 = vrot.slane %v189_v6, 4  ;;  %v199_v8 = vmul.f32 %v189_v6, %v189_v6 }
 0x165   :  { %v193_v9 = vadd.f32 %v192_v7, %v189_v6  ;;  %v200_v10 = vrot.slane %v199_v8, 4 }
 0x167   :  { %v194_v11 = vrot.slane %v193_v9, 2  ;;  %v201_v12 = vadd.f32 %v200_v10, %v199_v8 }
 0x169   :  { %v195_v13 = vadd.f32 %v194_v11, %v193_v9  ;;  %v202_v14 = vrot.slane %v201_v12, 2 }
 0x16b   :  { %v196_v15 = vrot.slane %v195_v13, 1  ;;  %v203_v16 = vadd.f32 %v202_v14, %v201_v12 }
 0x16d   :  { %v197_v17 = vadd.f32 %v196_v15, %v195_v13  ;;  %v204_v18 = vrot.slane %v203_v16, 1 }
 0x16f   :  { %v198_v19 = vmul.f32 0.125, %v197_v17  ;;  %v205_v20 = vadd.f32 %v204_v18, %v203_v16 }
 0x171   :  { %v206_v21 = vmul.f32 0.125, %v205_v20  ;;  %v207_v22 = vmul.f32 %v198_v19, %v198_v19 }
 0x173   :  { %v208_v23 = vsub.f32 %v206_v21, %v207_v22 }
 0x175   :  { %v209_v24 = vmax.f32 %v208_v23, 0.0 }
 0x177   :  { %v211_v25 = vadd.f32 1e-05, %v209_v24 }
 0x179   :  { %260 = vrsqrt.f32 %v211_v25  ;;  %vm218_vm4 = vweird.f32 %v211_v25 }
 0x17f   :  { %v261_v26 = vpop.eup %260 }
 0x180   :  { %v213_v27 = vmul.f32 %v261_v26, %v211_v25  ;;  %vm219_vm3 = vweird.f32 %v261_v26 }
 0x181   :  { %vm220_vm5 = vmor %vm218_vm4, %vm219_vm3 }
 0x182   :  { %v214_v28 = vmul.f32 %v261_v26, %v213_v27 }
 0x184   :  { %v215_v29 = vmul.f32 0.5, %v214_v28 }
 0x186   :  { %v216_v30 = vsub.f32 1.5, %v215_v29 }
 0x188   :  { %v217_v32 = vmul.f32 %v261_v26, %v216_v30 }
 0x18a   :  { %v221_v33 = vsel %vm220_vm5, %v261_v26, %v217_v32 }
 0x18b   :  { %v222_v34 = vmul.f32 %v221_v33, %v210_v31 }
 0x18d   :  { %v224_v36 = vmul.f32 %v222_v34, %v198_v19  ;;  %v226_v37 = vperm.slane %v222_v34, 0 }
 0x18f   :  { %v225_v38 = vsub.f32 %v223_v35, %v224_v36  ;;  %v227_v39 = vmul.f32 %v226_v37, %v189_v6 }
 0x191   :  { %v228_v40 = vperm.slane %v225_v38, 0 }
 0x193   :  { %v229_v41 = vadd.f32 %v228_v40, %v227_v39 }
 0x195   :  { %v230_v42 = vmax.f32 %v229_v41, 0.0 }
 0x197   :  { %231 = vst [vmem:[#allocation10] sm:$0xff] %v230_v42 }
 0x198   :  { %242 = dma.vmem_to_hbm [thread:$0]  %s238_s16, 128, %s240_s19, [#allocation4]  }
 0x199   :  { %388 = dma.done.wait [#allocation4], 128  }
 0x19a   :  { %389 = vsyncadd [#allocation4], 4294967168 }
 0x19b   :  { %247 = vsyncpa [#allocation3], 1 }
 0x19c   :  { %248 = vsyncpa [#allocation6], 1 }
 0x19d   :  { %249 = vsyncpa [#allocation9], 1 }
 0x19e   :  { %250 = vsyncpa [#allocation4], 1 }

</bundles_post_ra>
